<compile_context>
chip_gen: v6e
topology: v6e:2x2x1
jax: 0.10.0
libtpu: 0.0.40
codegen_flags: <defaults>
</compile_context>

<pallas_src>
import functools

import jax
import jax.numpy as jnp
from jax.experimental import pallas as pl
from jax.experimental.pallas import tpu as pltpu


def _vmem_capacity_bytes():
    try:
        return int(pltpu.get_tpu_info().vmem_capacity_bytes)
    except Exception:
        return 64 << 20  # conservative default (v7x per-TensorCore)


_VMEM_CAPACITY = _vmem_capacity_bytes()


def _ffn_kernel(x_ref, w1_ref, b1_ref, w2_ref, b2_ref, o_ref, acc_ref):
    # x_ref:  (TM, H)  input dtype (e.g. f32)
    # w1_ref: (H, TP)  bf16          b1_ref: (1, TP) f32
    # w2_ref: (TP, H)  bf16          b2_ref: (1, H)  f32
    # o_ref:  (TM, H)  out dtype     acc_ref: (TM, H) f32 scratch
    p = pl.program_id(1)

    @pl.when(p == 0)
    def _():
        acc_ref[...] = jnp.zeros_like(acc_ref)

    x = x_ref[...].astype(w1_ref.dtype)            # in-kernel cast to bf16
    h = jnp.dot(x, w1_ref[...], preferred_element_type=jnp.float32)
    h = h + b1_ref[...]                            # bias in f32
    h = jnp.maximum(h, 0.0)                        # ReLU
    # dropout (eval/inference mode) == identity
    h = h.astype(w2_ref.dtype)                     # bf16 for the second MXU pass
    acc_ref[...] += jnp.dot(h, w2_ref[...], preferred_element_type=jnp.float32)

    @pl.when(p == pl.num_programs(1) - 1)
    def _():
        o_ref[...] = (acc_ref[...] + b2_ref[...]).astype(o_ref.dtype)


def _pick_tp(P, block_p):
    """Largest P-tile that is a multiple of 128, divides P and is <= block_p.
    Falls back to the full extent (no P-tiling) when no such divisor exists,
    so the reduction axis never reads padded (garbage) weight columns."""
    if P <= block_p:
        return P
    t = (block_p // 128) * 128
    while t >= 128:
        if P % t == 0:
            return t
        t -= 128
    return P


@functools.partial(jax.jit, static_argnames=("block_rows", "block_p", "compute_dtype"))
def position_wise_ffn(x, w1, b1, w2, b2, *, block_rows=512, block_p=1024,
                      compute_dtype=jnp.bfloat16):
    """x: (B, S, H). w1: (H, P) , w2: (P, H) (ideally already bf16). Returns (B, S, H)."""
    B, S, H = x.shape
    P = w1.shape[1]
    M = B * S
    out_dtype = x.dtype

    # --- row tile (parallel axis) ----------------------------------------
    tm = min(block_rows, M)
    if M >= 16:
        # at least 2 row tiles so a 2-TC chip (v7x) can shard the "parallel" axis
        tm = min(tm, (M + 1) // 2)
    if tm < M:
        tm = max(8, (tm // 8) * 8)

    # --- pwff tile (reduction axis, last) ---------------------------------
    tp = _pick_tp(P, block_p)

    xbytes = x.dtype.itemsize
    obytes = jnp.dtype(out_dtype).itemsize
    cbytes = jnp.dtype(compute_dtype).itemsize

    def vmem_needed(tm_, tp_):
        return (
            2 * tm_ * H * xbytes              # x tiles (double-buffered)
            + 2 * H * tp_ * cbytes            # W1 slabs (streamed, 2-buffered)
            + 2 * tp_ * H * cbytes            # W2 slabs
            + 2 * (tp_ + H) * 4               # biases
            + 2 * tm_ * H * obytes            # out tiles
            + tm_ * H * 4                     # f32 accumulator scratch
            + tm_ * tp_ * (4 + cbytes)        # f32 h slab + bf16 copy
            + (2 << 20)                       # compiler scratch slack
        )

    # Shrink tiles to the queried per-core VMEM budget (64 MiB v7x, 128 MiB v5e/v6e).
    budget = max(24 << 20, _VMEM_CAPACITY - (4 << 20))
    while vmem_needed(tm, tp) > budget:
        if tp >= 256 and tp % 256 == 0 and P % (tp // 2) == 0:
            tp //= 2
        elif tm >= 16 and tm % 16 == 0:
            tm //= 2
        else:
            break
    vmem_limit = int(min(max(vmem_needed(tm, tp), 24 << 20),
                         _VMEM_CAPACITY - (2 << 20)))

    grid = (pl.cdiv(M, tm), pl.cdiv(P, tp))

    # Weights should already be persisted in the compute dtype; only cast if not.
    w1c = w1 if w1.dtype == compute_dtype else w1.astype(compute_dtype)
    w2c = w2 if w2.dtype == compute_dtype else w2.astype(compute_dtype)
    b1f = b1.astype(jnp.float32).reshape(1, P)
    b2f = b2.astype(jnp.float32).reshape(1, H)

    x2d = x.reshape(M, H)                     # no wrapper-side dtype cast

    n_row_tiles = pl.cdiv(M, tm)
    cost = pl.CostEstimate(
        flops=4 * M * H * P,                  # two matmuls, 2*M*H*P each
        transcendentals=0,
        bytes_accessed=(M * H * xbytes
                        + n_row_tiles * (H * P + P * H) * cbytes
                        + (P + H) * 4
                        + M * H * obytes),
    )

    out2d = pl.pallas_call(
        _ffn_kernel,
        out_shape=jax.ShapeDtypeStruct((M, H), out_dtype),
        grid_spec=pltpu.PrefetchScalarGridSpec(
            num_scalar_prefetch=0,
            grid=grid,
            in_specs=[
                pl.BlockSpec((tm, H), lambda i, p: (i, 0)),   # x row tile
                pl.BlockSpec((H, tp), lambda i, p: (0, p)),   # W1 slab (streamed)
                pl.BlockSpec((1, tp), lambda i, p: (0, p)),   # b1 slab
                pl.BlockSpec((tp, H), lambda i, p: (p, 0)),   # W2 slab (streamed)
                pl.BlockSpec((1, H),  lambda i, p: (0, 0)),   # b2 (constant)
            ],
            out_specs=pl.BlockSpec((tm, H), lambda i, p: (i, 0)),
            scratch_shapes=[pltpu.VMEM((tm, H), jnp.float32)],  # f32 accumulator
        ),
        compiler_params=pltpu.CompilerParams(
            dimension_semantics=("parallel", "arbitrary"),
            vmem_limit_bytes=vmem_limit,
        ),
        cost_estimate=cost,
    )(x2d, w1c, b1f, w2c, b2f)

    return out2d.reshape(B, S, H)


def _init_params(key, hid_dim, pwff_dim, compute_dtype=jnp.bfloat16):
    """Deterministic synthetic init (uniform, PyTorch-Linear-like bounds).
    Weights are converted to the MXU compute dtype ONCE here (persisted bf16);
    biases stay f32."""
    k1, k2, k3, k4 = jax.random.split(key, 4)
    bound1 = 1.0 / (hid_dim ** 0.5)
    bound2 = 1.0 / (pwff_dim ** 0.5)
    # stored pre-transposed relative to torch's (out, in) convention
    w1 = jax.random.uniform(k1, (hid_dim, pwff_dim), jnp.float32, -bound1, bound1)
    b1 = jax.random.uniform(k2, (1, pwff_dim), jnp.float32, -bound1, bound1)
    w2 = jax.random.uniform(k3, (pwff_dim, hid_dim), jnp.float32, -bound2, bound2)
    b2 = jax.random.uniform(k4, (1, hid_dim), jnp.float32, -bound2, bound2)
    return w1.astype(compute_dtype), b1, w2.astype(compute_dtype), b2


if __name__ == "__main__":
    key = jax.random.PRNGKey(0)
    k_x, k_p = jax.random.split(key)

    # Small demo shapes (NOT perf-representative: H, P < 128 lanes).
    batch, seq, hid_dim, pwff_dim = 2, 8, 32, 64
    x = jax.random.normal(k_x, (batch, seq, hid_dim), dtype=jnp.float32)
    w1, b1, w2, b2 = _init_params(k_p, hid_dim, pwff_dim)

    out = position_wise_ffn(x, w1, b1, w2, b2)
    out = jax.block_until_ready(out)

    # pure-JAX f32 reference using the same (bf16) weights; tolerance reflects
    # the deliberate bf16 cast of x and of the post-ReLU activation.
    w1f = w1.astype(jnp.float32)
    w2f = w2.astype(jnp.float32)
    ref = jnp.maximum(x.reshape(-1, hid_dim) @ w1f + b1, 0.0) @ w2f + b2
    ref = ref.reshape(batch, seq, hid_dim)

    assert out.shape == (batch, seq, hid_dim)
    assert out.dtype == x.dtype
    assert jnp.allclose(out, ref, atol=5e-2, rtol=5e-2), (
        float(jnp.max(jnp.abs(out - ref))))

    print("KERNEL_OK")
</pallas_src>

<mosaic_0001>
module attributes {stable_mosaic.version = 11 : i64} {
  func.func @_ffn_kernel(%arg0: i32, %arg1: i32, %arg2: memref<8x32xf32, #tpu.memory_space<vmem>>, %arg3: memref<32x64xbf16, #tpu.memory_space<vmem>>, %arg4: memref<1x64xf32, #tpu.memory_space<vmem>>, %arg5: memref<64x32xbf16, #tpu.memory_space<vmem>>, %arg6: memref<1x32xf32, #tpu.memory_space<vmem>>, %arg7: memref<8x32xf32, #tpu.memory_space<vmem>>, %arg8: memref<8x32xf32, #tpu.memory_space<vmem>>) attributes {dimension_semantics = [#tpu.dimension_semantics<parallel>, #tpu.dimension_semantics<arbitrary>], iteration_bounds = array<i64: 2, 1>, scalar_prefetch = 0 : i64, scratch_operands = 1 : i64, tpu.core_type = #tpu.core_type<tc>, window_params = [{transform_indices = @transform_0, window_bounds = array<i64: 8, 32>}, {transform_indices = @transform_1, window_bounds = array<i64: 32, 64>}, {transform_indices = @transform_2, window_bounds = array<i64: 1, 64>}, {transform_indices = @transform_3, window_bounds = array<i64: 64, 32>}, {pipeline_mode = #tpu.pipeline_mode<synchronous>, transform_indices = @transform_4, window_bounds = array<i64: 1, 32>}, {transform_indices = @transform_5, window_bounds = array<i64: 8, 32>}]} {
    %c0_i32 = arith.constant 0 : i32
    %0 = arith.cmpi eq, %arg1, %c0_i32 : i32
    %1 = arith.extui %0 : i1 to i32
    %c0_i32_0 = arith.constant 0 : i32
    %2 = arith.cmpi ne, %1, %c0_i32_0 : i32
    scf.if %2 {
      %cst_16 = arith.constant 0.000000e+00 : f32
      %21 = vector.broadcast %cst_16 : f32 to vector<8x32xf32>
      %c0_17 = arith.constant 0 : index
      %c0_18 = arith.constant 0 : index
      %22 = vector.load %arg8[%c0_17, %c0_18] : memref<8x32xf32, #tpu.memory_space<vmem>>, vector<8x32xf32>
      tpu.vector_store %arg8[%c0_17, %c0_18], %21 {strides = array<i32>} : memref<8x32xf32, #tpu.memory_space<vmem>>, vector<8x32xf32>,
    } else {
    }
    %c0 = arith.constant 0 : index
    %c0_1 = arith.constant 0 : index
    %3 = vector.load %arg2[%c0, %c0_1] : memref<8x32xf32, #tpu.memory_space<vmem>>, vector<8x32xf32>
    %4 = arith.truncf %3 : vector<8x32xf32> to vector<8x32xbf16>
    %c0_2 = arith.constant 0 : index
    %c0_3 = arith.constant 0 : index
    %5 = vector.load %arg3[%c0_2, %c0_3] : memref<32x64xbf16, #tpu.memory_space<vmem>>, vector<32x64xbf16>
    %cst = arith.constant dense<0.000000e+00> : vector<8x64xf32>
    %6 = tpu.matmul %4, %5, %cst {dimension_numbers = #tpu.dot_dimension_numbers<[1], [0], [0], [1], [0, 0, 1, 1], [], []>} : vector<8x32xbf16>, vector<32x64xbf16>, vector<8x64xf32> -> vector<8x64xf32>
    %c0_4 = arith.constant 0 : index
    %c0_5 = arith.constant 0 : index
    %7 = vector.load %arg4[%c0_4, %c0_5] : memref<1x64xf32, #tpu.memory_space<vmem>>, vector<1x64xf32>
    %8 = vector.broadcast %7 : vector<1x64xf32> to vector<8x64xf32>
    %9 = arith.addf %6, %8 : vector<8x64xf32>
    %cst_6 = arith.constant 0.000000e+00 : f32
    %10 = vector.broadcast %cst_6 : f32 to vector<8x64xf32>
    %11 = arith.maximumf %9, %10 : vector<8x64xf32>
    %12 = arith.truncf %11 : vector<8x64xf32> to vector<8x64xbf16>
    %c0_7 = arith.constant 0 : index
    %c0_8 = arith.constant 0 : index
    %13 = vector.load %arg8[%c0_7, %c0_8] : memref<8x32xf32, #tpu.memory_space<vmem>>, vector<8x32xf32>
    %c0_9 = arith.constant 0 : index
    %c0_10 = arith.constant 0 : index
    %14 = vector.load %arg5[%c0_9, %c0_10] : memref<64x32xbf16, #tpu.memory_space<vmem>>, vector<64x32xbf16>
    %cst_11 = arith.constant dense<0.000000e+00> : vector<8x32xf32>
    %15 = tpu.matmul %12, %14, %cst_11 {dimension_numbers = #tpu.dot_dimension_numbers<[1], [0], [0], [1], [0, 0, 1, 1], [], []>} : vector<8x64xbf16>, vector<64x32xbf16>, vector<8x32xf32> -> vector<8x32xf32>
    %16 = arith.addf %13, %15 : vector<8x32xf32>
    %c0_12 = arith.constant 0 : index
    %c0_13 = arith.constant 0 : index
    %17 = vector.load %arg8[%c0_12, %c0_13] : memref<8x32xf32, #tpu.memory_space<vmem>>, vector<8x32xf32>
    tpu.vector_store %arg8[%c0_12, %c0_13], %16 {strides = array<i32>} : memref<8x32xf32, #tpu.memory_space<vmem>>, vector<8x32xf32>,
    %c0_i32_14 = arith.constant 0 : i32
    %18 = arith.cmpi eq, %arg1, %c0_i32_14 : i32
    %19 = arith.extui %18 : i1 to i32
    %c0_i32_15 = arith.constant 0 : i32
    %20 = arith.cmpi ne, %19, %c0_i32_15 : i32
    scf.if %20 {
      %c0_16 = arith.constant 0 : index
      %c0_17 = arith.constant 0 : index
      %21 = vector.load %arg8[%c0_16, %c0_17] : memref<8x32xf32, #tpu.memory_space<vmem>>, vector<8x32xf32>
      %c0_18 = arith.constant 0 : index
      %c0_19 = arith.constant 0 : index
      %22 = vector.load %arg6[%c0_18, %c0_19] : memref<1x32xf32, #tpu.memory_space<vmem>>, vector<1x32xf32>
      %23 = vector.broadcast %22 : vector<1x32xf32> to vector<8x32xf32>
      %24 = arith.addf %21, %23 : vector<8x32xf32>
      %c0_20 = arith.constant 0 : index
      %c0_21 = arith.constant 0 : index
      %25 = vector.load %arg7[%c0_20, %c0_21] : memref<8x32xf32, #tpu.memory_space<vmem>>, vector<8x32xf32>
      tpu.vector_store %arg7[%c0_20, %c0_21], %24 {strides = array<i32>} : memref<8x32xf32, #tpu.memory_space<vmem>>, vector<8x32xf32>,
    } else {
    }
    return
  }
  func.func @transform_0(%arg0: i32, %arg1: i32) -> (i32, i32) {
    %c0_i32 = arith.constant 0 : i32
    %c0_i32_0 = arith.constant 0 : i32
    return %arg0, %c0_i32 : i32, i32
  }
  func.func @transform_1(%arg0: i32, %arg1: i32) -> (i32, i32) {
    %c0_i32 = arith.constant 0 : i32
    %c0_i32_0 = arith.constant 0 : i32
    return %c0_i32, %arg1 : i32, i32
  }
  func.func @transform_2(%arg0: i32, %arg1: i32) -> (i32, i32) {
    %c0_i32 = arith.constant 0 : i32
    %c0_i32_0 = arith.constant 0 : i32
    return %c0_i32, %arg1 : i32, i32
  }
  func.func @transform_3(%arg0: i32, %arg1: i32) -> (i32, i32) {
    %c0_i32 = arith.constant 0 : i32
    %c0_i32_0 = arith.constant 0 : i32
    return %arg1, %c0_i32 : i32, i32
  }
  func.func @transform_4(%arg0: i32, %arg1: i32) -> (i32, i32) {
    %c0_i32 = arith.constant 0 : i32
    %c0_i32_0 = arith.constant 0 : i32
    %c0_i32_1 = arith.constant 0 : i32
    return %c0_i32, %c0_i32_0 : i32, i32
  }
  func.func @transform_5(%arg0: i32, %arg1: i32) -> (i32, i32) {
    %c0_i32 = arith.constant 0 : i32
    %c0_i32_0 = arith.constant 0 : i32
    return %arg0, %c0_i32 : i32, i32
  }
}

</mosaic_0001>

<bundles_post_ra>
// kernel: position_wise_ffn.1
= control target key start
LH: loop header
LB: loop body
LE: loop exit
PB: predicated region body
PF: predicated region fallthrough
CT: control target
= control target key end

     0   :  { %10 = vsyncpa [#allocation4], 0  ;;  %s931_s0 = inlined_call_operand.vmem [shape: f32[16,32], index: 0, kind: input, shape index: {}]   ;;  %s932_s1 = inlined_call_operand.vmem [shape: bf16[32,64], index: 1, kind: input, shape index: {}]   ;;  %s933_s2 = inlined_call_operand.vmem [shape: f32[1,64], index: 2, kind: input, shape index: {}]   ;;  %s934_s3 = inlined_call_operand.vmem [shape: bf16[64,32], index: 3, kind: input, shape index: {}]   ;;  %s935_s4 = inlined_call_operand.vmem [shape: f32[1,32], index: 4, kind: input, shape index: {}]   ;;  %s936_s5 = inlined_call_operand.hbm [shape: f32[16,32], index: 5, kind: output, shape index: {}]  }
   0x1   :  { %12 = vsyncpa [#allocation4 + $0x1], 0  ;;  %s804_s18 = smov 0   ;;  %s806_s19 = smov 0  }
   0x2   :  { %s808_s20 = smov 0   ;;  %s810_s21 = smov 0  }
   0x3   :  { %s812_s22 = smov 0   ;;  %s814_s23 = smov 0  }
   0x4 LB: > { %s578_s24 = sadd.s32 4294967295, %s769_s23   ;;  %s579_s25 = sadd.s32 4294967294, %s769_s23   ;;  %s769_s23 = sphi %s814_s23, %s18_s23   ;;  %s765_s22 = sphi %s812_s22, %s943_s22   ;;  %s761_s21 = sphi %s810_s21, %s942_s21   ;;  %s757_s20 = sphi %s808_s20, %s941_s20   ;;  %s753_s19 = sphi %s806_s19, %s940_s19   ;;  %s749_s18 = sphi %s804_s18, %s939_s18  }
   0x5   : > { %s30_s26 = sadd.s32 1, %s765_s22  ;;  %s162_s27 = sadd.s32 1, %s757_s20 }
   0x6   : > { %p32_p0 = scmp.ge.s32.totalorder %s30_s26, 2  ;;  %p172_p1 = scmp.ne.s32.totalorder %s757_s20, %s753_s19 }
   0x7   : > { %p173_p2 = scmp.eq.s32.totalorder %s578_s24, 1  ;;  %p178_p3 = scmp.ne.s32.totalorder %s753_s19, %s749_s18 }
   0x8   : > { %s945_s26 = smov (%p32_p0, %s30_s26), 0  ;;  %p179_p5 = scmp.eq.s32.totalorder %s579_s25, 1 }
   0x9   : > { %p844_p4 = por %p173_p2, %p172_p1  ;;  %s159_s29 = ssub.s32 %s765_s22, %s945_s26 }
   0xa   : > { %p585_p6 = scmp.ge.s32.totalorder %s769_s23, 1  ;;  %p160_p7 = scmp.eq.s32.totalorder %s159_s29, 0 }
   0xb   : > { %p851_p8 = por %p179_p5, %p178_p3  ;;  %p229_p9 = scmp.lt.s32.totalorder %s769_s23, 3 }
   0xc   : > { %s857_s6 = scalar_select %p160_p7, %s757_s20, %s162_s27  }
   0xd   : > { %p230_p10 = pnand %p585_p6, %p229_p9 }
   0xe   : > { %p268_p11 = scmp.lt.s32.totalorder (!%p230_p10), %s761_s21, 1  ;;  %s265_s11 = sand.u32 (!%p230_p10), 1, %s753_s19  }
   0xf   : > { %233 = sbr.rel (%p230_p10) target bundleno = 446 (0x1be), region = 40  ;;  %s586_s12 = sshll.u32 (!%p230_p10), %s265_s11, 3 }
  0x10   : > { %s599_s15 = sshll.u32 (!%p230_p10), %s761_s21, 7  ;;  %s456_s29 = scalar_lea.sflag (!%p230_p10), [#allocation4], %s265_s11 }
  0x11   : > { %s467_s27 = scalar_lea.hbm (!%p230_p10), %s936_s5, %s599_s15  ;;  %s773_s8 = smov (!%p230_p10), [#allocation3]  }
  0x12   : > { %s697_s9 = sshll.u32 (!%p230_p10), %s773_s8, 4  ;;  %s698_s9 = int_to_ptr.vmem [resolvable:$false] %s697_s9 }
  0x14   : > { %v687_v0 = vld [vmem:[%s932_s1 + $0x8] sm:$0xff]   ;;  %v771_v1 = vmov 0.0   ;;  %v688_v2 = vld [vmem:[%s932_s1] sm:$0xff]   ;;  %vm772_vm0 = vmmov 0   ;;  %vm290_vm1 = vcmask 261120   ;;  %v689_v3 = vld [vmem:[%s934_s3 + $0x18] sm:$0xff]  }
  0x15   : > { %610 = vmatprep.subr.bf16.mxu0 %v771_v1  ;;  %618 = vmatprep.subr.bf16.mxu1 %v771_v1  ;;  %291 = vst.msk [vmem:[#allocation2] sm:$0xff] %vm290_vm1, %v771_v1  ;;  %s269_s13 = scalar_select %p268_p11, %s761_s21, 1  ;;  %v690_v4 = vld [vmem:[%s934_s3 + $0x10] sm:$0xff]   ;;  %v691_v7 = vld [vmem:[%s934_s3 + $0x8] sm:$0xff]   ;;  %v692_v8 = vld [vmem:[%s934_s3] sm:$0xff]   ;;  %vm396_vm2 = vcmask 523264  }
  0x16   : > { %611 = vmatpush3.bf16.msra.mxu0 %v687_v0  ;;  %614 = vmatprep.mubr.msk.bf16.mxu0 %vm772_vm0, %v771_v1  ;;  %v588_v9 = vld [vmem:[%s933_s2] ss:$0 sm:$0xff]  ;;  %s699_s21 = scalar_lea.vmem %s698_s9, 256 }
  0x17   : > { %612 = vmatprep.subr.bf16.mxu0 %v771_v1  ;;  %626 = vmatprep.mubr.msk.bf16.mxu1 %vm772_vm0, %v771_v1  ;;  %s587_s16 = sshll.u32 %s269_s13, 3  ;;  %v597_v23 = vld [vmem:[%s935_s4] ss:$0 sm:$0xff] }
  0x18   : > { %619 = vmatpush3.bf16.msra.mxu1 %v689_v3  ;;  %s271_s25 = scalar_lea.vmem %s931_s0, %s587_s16  ;;  %s267_s16 = scalar_lea.vmem [#allocation3], %s586_s12 }
  0x19   : > { %620 = vmatprep.subr.bf16.mxu1 %v771_v1  ;;  %v292_v5 = vld [vmem:[%s271_s25] sm:$0xff]  ;;  %s469_s17 = sshll.u32 %s267_s16, 4  ;;  %s470_s17 = int_to_ptr.vmem [resolvable:$true] %s469_s17 }
  0x1a   : > { %613 = vmatpush3.bf16.msra.mxu0 %v688_v2  ;;  %v293_v6 = vpack.c.bf16 %v292_v5, %v292_v5  ;;  %s693_s7 = scalar_lea.vmem %s470_s17, 128  ;;  %p700_p1 = scmp.lt.s32.totalorder %s470_s17, %s698_s9 }
  0x1b   : > { %p694_p12 = scmp.ne.s32.totalorder %s470_s17, %s693_s7  ;;  %p701_p2 = scmp.lt.s32.totalorder %s699_s21, %s693_s7 }
  0x1c   : > { %621 = vmatpush3.bf16.msra.mxu1 %v690_v4  ;;  %v363_v17 = vld [vmem:[#allocation2] sm:$0xff] }
  0x1d   : > { %622 = vmatprep.subr.bf16.mxu1 %v771_v1  ;;  %615 = vmatmul.mubr.msk.bf16.vlgmr.msra.gmra.mxu0 %vm290_vm1, %v293_v6  ;;  %p695_p13 = pnand %p694_p12, %p844_p4  ;;  %p702_p3 = por %p701_p2, %p700_p1 }
  0x1f   : > { %p696_p0 = pneg %p695_p13 }
  0x20   : > { %623 = vmatpush3.bf16.msra.mxu1 %v691_v7 }
  0x21   : > { %624 = vmatprep.subr.bf16.mxu1 %v771_v1  ;;  %p703_p5 = pnand %p702_p3, %p696_p0 }
  0x24   : > { %625 = vmatpush3.bf16.msra.mxu1 %v692_v8 }
  0xdd   : > { %v355_v10 = vpop.f32.mrf.mxu0 }
  0xde   : > { %v356_v11 = vadd.f32 %v588_v9, %v355_v10 }
  0xdf   : > { %v616_v12 = vpop.f32.mrf.mxu0 }
  0xe0   : > { %v361_v13 = vmax.f32 %v356_v11, 0.0 }
  0xe1   : > { %v358_v14 = vpop.f32.mrf.mxu0 }
  0xe2   : > { %v362_v15 = vpack.c.bf16 %v361_v13, %v361_v13 }
  0xe3   : > { %v617_v16 = vpop.f32.mrf.mxu0 }
  0xe4   : > { %627 = vmatmul.mubr.msk.bf16.vlgmr.msra.gmra.mxu1 %vm396_vm2, %v362_v15 }
 0x1a4   : > { %v434_v18 = vpop.f32.mrf.mxu1 }
 0x1a5   : > { %v440_v19 = vadd.f32 %v434_v18, %v363_v17 }
 0x1a6   : > { %v628_v20 = vpop.f32.mrf.mxu1 }
 0x1a7   : > { %441 = vst.msk [vmem:[#allocation2] sm:$0xff] %vm290_vm1, %v440_v19 }
 0x1a8   : > { %v437_v21 = vpop.f32.mrf.mxu1 }
 0x1aa   : > { %v629_v22 = vpop.f32.mrf.mxu1 }
 0x1ae   : > { %v445_v24 = vld [vmem:[#allocation2] sm:$0xff] }
 0x1af   : > { %v453_v25 = vadd.f32 %v597_v23, %v445_v24 }
 0x1b1   : > { %454 = vst.msk [vmem:[%s267_s16] sm:$0xff] %vm290_vm1, %v453_v25 }
 0x1b2   : > { %706 = shalt.err (!%p703_p5)
}
 0x1b3   : > { %s707_s10 = scalar_lea.hbm %s467_s27, 128  ;;  %s711_s13 = scalar_lea.hbm %s936_s5, 256 }
 0x1b4   : > { %p708_p6 = scmp.ne.s32.totalorder %s467_s27, %s707_s10  ;;  %p712_p10 = scmp.lt.s32.totalorder %s467_s27, %s936_s5 }
 0x1b5   : > { %p713_p11 = scmp.lt.s32.totalorder %s711_s13, %s707_s10 }
 0x1b6   : > { %p709_p7 = pnand %p708_p6, %p844_p4 }
 0x1b7   : > { %p714_p12 = por %p713_p11, %p712_p10 }
 0x1b8   : > { %p710_p9 = pneg %p709_p7 }
 0x1ba   : > { %p715_p13 = pnand %p714_p12, %p710_p9 }
 0x1bc   : > { %718 = shalt.err (!%p715_p13)
}
 0x1bd   : > { %630 = dma.vmem_to_hbm [thread:$0]  (%p844_p4), %s470_s17, 128, %s467_s27, %s456_s29  }
 0x1be PF: > { %p636_p0 = scmp.ge.s32.totalorder %s769_s23, 2  ;;  %s481_s16 = sand.u32 1, %s749_s18  }
 0x1bf   : > { %s482_s24 = scalar_lea.sflag [#allocation4], %s481_s16 }
 0x1c0   : > { %p633_p1 = pnand %p636_p0, %p851_p8 }
 0x1c2   : > { %p634_p2 = pneg %p633_p1 }
 0x1c4   : > { %744 = dma.done.wait (%p634_p2), %s482_s24, 128  }
 0x1c5   : > { %746 = vsyncadd (%p634_p2), %s482_s24, 4294967168  ;;  %s18_s23 = sadd.s32 1, %s769_s23   ;;  %s939_s18 = smov %s753_s19 }
 0x1c6   : > { %p15_p3 = scmp.ge.s32.totalorder %s18_s23, 4   ;;  %s940_s19 = smov %s757_s20 }
 0x1c7   : > { %s941_s20 = smov %s857_s6  ;;  %s942_s21 = smov %s765_s22 }
 0x1c8   : > { %s943_s22 = smov %s945_s26  ;;  %17 = sbr.rel (!%p15_p3) target bundleno = 4 (0x4), region = 92 }
 0x1cd   :  { %487 = vsyncpa [#allocation4], 1 }
 0x1ce   :  { %489 = vsyncpa [#allocation4 + $0x1], 1 }

</bundles_post_ra>
